<compile_context>
chip_gen: v7x
topology: tpu7x:2x2x1
jax: 0.10.0
libtpu: 0.0.40
codegen_flags: <defaults>
</compile_context>

<pallas_src>
import math
import functools

import jax
import jax.numpy as jnp
import numpy as np
from jax import lax
from jax.experimental import pallas as pl
from jax.experimental.pallas import tpu as pltpu


# --------------------------------------------------------------------------
# Tiling helper: largest multiple of `base` that divides `dim` and is <= pref,
# otherwise fall back to the full dim (always legal: block == full array dim).
# --------------------------------------------------------------------------
def _pick_tile(dim, pref, base):
    if dim <= pref:
        return dim
    t = (min(pref, dim) // base) * base
    while t >= base:
        if dim % t == 0:
            return t
        t -= base
    return dim


# --------------------------------------------------------------------------
# Tiled matmul kernel (no bias; q_bias=k_bias=v_bias=o_bias=False).
# Used for the fused QKV projection.
# --------------------------------------------------------------------------
def _matmul_kernel(x_ref, w_ref, o_ref, acc_ref):
    @pl.when(pl.program_id(2) == 0)
    def _init():
        acc_ref[...] = jnp.zeros_like(acc_ref)

    acc_ref[...] += jnp.dot(x_ref[...], w_ref[...],
                            preferred_element_type=jnp.float32)

    @pl.when(pl.program_id(2) == pl.num_programs(2) - 1)
    def _store():
        o_ref[...] = acc_ref[...].astype(o_ref.dtype)


def matmul(x2d, w, *, tm_pref=256, tn_pref=256, tk_pref=512):
    """y = x2d @ w  (w is the already-transposed PyTorch weight, shape (in, out))."""
    M, K = x2d.shape
    K2, N = w.shape
    assert K == K2
    tm = _pick_tile(M, tm_pref, 8)
    tn = _pick_tile(N, tn_pref, 128)
    tk = _pick_tile(K, tk_pref, 128)
    grid = (M // tm, N // tn, K // tk)
    return pl.pallas_call(
        _matmul_kernel,
        grid=grid,
        in_specs=[
            pl.BlockSpec((tm, tk), lambda i, j, kk: (i, kk)),
            pl.BlockSpec((tk, tn), lambda i, j, kk: (kk, j)),
        ],
        out_specs=pl.BlockSpec((tm, tn), lambda i, j, kk: (i, j)),
        out_shape=jax.ShapeDtypeStruct((M, N), x2d.dtype),
        scratch_shapes=[pltpu.VMEM((tm, tn), jnp.float32)],
        compiler_params=pltpu.CompilerParams(
            dimension_semantics=("parallel", "parallel", "arbitrary")),
    )(x2d, w)


# --------------------------------------------------------------------------
# RoPE kernel: applied exactly once per (batch, head-or-group, position).
# --------------------------------------------------------------------------
def _rotate_half(x):
    """cat((-x2, x1), dim=-1) where x1/x2 are the two halves of the last dim."""
    d = x.shape[-1]
    if d % 128 == 0:
        # Lane rotation on the XLU (free slot) + sign multiply folded into VPU.
        rolled = pltpu.roll(x, shift=d // 2, axis=-1)          # = cat((x2, x1))
        idx = lax.broadcasted_iota(jnp.int32, x.shape, len(x.shape) - 1)
        sign = jnp.where(idx < d // 2,
                         jnp.asarray(-1.0, x.dtype), jnp.asarray(1.0, x.dtype))
        return rolled * sign
    # Small-D fallback (e.g. toy D=8): split + concat.
    x1 = x[..., : d // 2]
    x2 = x[..., d // 2:]
    return jnp.concatenate([-x2, x1], axis=-1)


def _rope_kernel(x_ref, cos_ref, sin_ref, o_ref):
    x = x_ref[0, 0]                      # (tq, D)
    cos = cos_ref[...]
    sin = sin_ref[...]
    roped = x * cos + _rotate_half(x) * sin
    o_ref[0, 0] = roped.astype(o_ref.dtype)


def apply_rope_pallas(x, cos, sin, tq):
    """x: (B, NH, T, D); cos/sin: (T, D)."""
    B, NH, T, D = x.shape
    return pl.pallas_call(
        _rope_kernel,
        grid=(B, NH, T // tq),
        in_specs=[
            pl.BlockSpec((1, 1, tq, D), lambda b, h, qi: (b, h, qi, 0)),
            pl.BlockSpec((tq, D), lambda b, h, qi: (qi, 0)),
            pl.BlockSpec((tq, D), lambda b, h, qi: (qi, 0)),
        ],
        out_specs=pl.BlockSpec((1, 1, tq, D), lambda b, h, qi: (b, h, qi, 0)),
        out_shape=jax.ShapeDtypeStruct(x.shape, x.dtype),
        compiler_params=pltpu.CompilerParams(
            dimension_semantics=("parallel", "parallel", "parallel")),
    )(x, cos, sin)


# --------------------------------------------------------------------------
# Flash-style causal attention.  Grid (B, H, T//tq, T//tk), KV axis last and
# "arbitrary"; m/l/acc live in VMEM scratch with pl.when init/finalize.
# GQA head->group sharing is done via the k/v index_map (h // rep).
# --------------------------------------------------------------------------
def _flash_kernel(q_ref, k_ref, v_ref, o_ref, m_sc, l_sc, acc_sc,
                  *, scale, tq, tk):
    ki = pl.program_id(3)
    n_kv = pl.num_programs(3)

    @pl.when(ki == 0)
    def _init():
        m_sc[...] = jnp.full_like(m_sc, -jnp.inf)
        l_sc[...] = jnp.zeros_like(l_sc)
        acc_sc[...] = jnp.zeros_like(acc_sc)

    q_start = pl.program_id(2) * tq
    k_start = ki * tk

    # Causal tile skip: tiles entirely above the diagonal contribute nothing.
    @pl.when(k_start <= q_start + (tq - 1))
    def _body():
        q = q_ref[0, 0]                     # (tq, D), input dtype (bf16-friendly)
        k = k_ref[0, 0]                     # (tk, D)
        v = v_ref[0, 0]                     # (tk, D)

        # Contract on the last dim of both operands (no k.T materialization);
        # accumulate in f32.
        s = lax.dot_general(q, k, (((1,), (1,)), ((), ())),
                            preferred_element_type=jnp.float32) * scale  # (tq, tk) f32

        # Causal mask (scores are f32, so -1e30 is safe).
        row = q_start + lax.broadcasted_iota(jnp.int32, (tq, tk), 0)
        col = k_start + lax.broadcasted_iota(jnp.int32, (tq, tk), 1)
        s = jnp.where(col <= row, s, -1e30)

        m_prev = m_sc[...]                                       # (tq, 1)
        m_new = jnp.maximum(m_prev, jnp.max(s, axis=-1, keepdims=True))
        alpha = jnp.exp(m_prev - m_new)
        p = jnp.exp(s - m_new)                                   # (tq, tk) f32
        l_sc[...] = alpha * l_sc[...] + jnp.sum(p, axis=-1, keepdims=True)
        pv = jnp.dot(p.astype(v.dtype), v, preferred_element_type=jnp.float32)
        acc_sc[...] = alpha * acc_sc[...] + pv
        m_sc[...] = m_new

    @pl.when(ki == n_kv - 1)
    def _finalize():
        inv_l = pl.reciprocal(l_sc[...], approx=True)            # EUP, ~free
        o_ref[0, 0] = (acc_sc[...] * inv_l).astype(o_ref.dtype)


def flash_attention(q, k, v, *, tq, tk):
    """q: (B, H, T, D); k, v: (B, G, T, D).  Returns (B, H, T, D)."""
    B, H, T, D = q.shape
    G = k.shape[1]
    rep = H // G
    scale = 1.0 / math.sqrt(D)
    kernel = functools.partial(_flash_kernel, scale=scale, tq=tq, tk=tk)
    return pl.pallas_call(
        kernel,
        grid=(B, H, T // tq, T // tk),
        in_specs=[
            pl.BlockSpec((1, 1, tq, D), lambda b, h, qi, ki: (b, h, qi, 0)),
            pl.BlockSpec((1, 1, tk, D), lambda b, h, qi, ki: (b, h // rep, ki, 0)),
            pl.BlockSpec((1, 1, tk, D), lambda b, h, qi, ki: (b, h // rep, ki, 0)),
        ],
        out_specs=pl.BlockSpec((1, 1, tq, D), lambda b, h, qi, ki: (b, h, qi, 0)),
        out_shape=jax.ShapeDtypeStruct((B, H, T, D), q.dtype),
        scratch_shapes=[
            pltpu.VMEM((tq, 1), jnp.float32),   # m
            pltpu.VMEM((tq, 1), jnp.float32),   # l
            pltpu.VMEM((tq, D), jnp.float32),   # acc
        ],
        compiler_params=pltpu.CompilerParams(
            dimension_semantics=("parallel", "parallel", "parallel", "arbitrary")),
    )(q, k, v)


# --------------------------------------------------------------------------
# O projection that reads the attention output in (B, H, T, D) layout directly:
# out[b, t, :] = sum_h y[b, h, t, :] @ wo[h*D:(h+1)*D, :]
# The (0,2,1,3) transpose is folded into the index_map (no XLA transpose).
# --------------------------------------------------------------------------
def _oproj_kernel(y_ref, w_ref, o_ref, acc_ref):
    h = pl.program_id(3)

    @pl.when(h == 0)
    def _init():
        acc_ref[...] = jnp.zeros_like(acc_ref)

    acc_ref[...] += jnp.dot(y_ref[0, 0], w_ref[0],
                            preferred_element_type=jnp.float32)

    @pl.when(h == pl.num_programs(3) - 1)
    def _store():
        o_ref[0] = acc_ref[...].astype(o_ref.dtype)


def o_proj(y_bhtd, wo, *, tm_pref=256, tn_pref=256):
    B, H, T, D = y_bhtd.shape
    C = wo.shape[1]
    assert wo.shape[0] == H * D
    w3 = wo.reshape(H, D, C)          # free reshape (row-major)
    tm = _pick_tile(T, tm_pref, 8)
    tn = _pick_tile(C, tn_pref, 128)
    return pl.pallas_call(
        _oproj_kernel,
        grid=(B, T // tm, C // tn, H),
        in_specs=[
            pl.BlockSpec((1, 1, tm, D), lambda b, i, j, h: (b, h, i, 0)),
            pl.BlockSpec((1, D, tn), lambda b, i, j, h: (h, 0, j)),
        ],
        out_specs=pl.BlockSpec((1, tm, tn), lambda b, i, j, h: (b, i, j)),
        out_shape=jax.ShapeDtypeStruct((B, T, C), y_bhtd.dtype),
        scratch_shapes=[pltpu.VMEM((tm, tn), jnp.float32)],
        compiler_params=pltpu.CompilerParams(
            dimension_semantics=("parallel", "parallel", "parallel", "arbitrary")),
    )(y_bhtd, w3)


# --------------------------------------------------------------------------
# SelfAttention.forward (mask=None, input_pos=None path)
# --------------------------------------------------------------------------
def self_attention_forward(x, params, cos, sin, n_heads, n_query_groups,
                           *, tq_pref=256, tk_pref=512):
    B, T, C = x.shape
    H, G = n_heads, n_query_groups
    D = C // H
    x2 = x.reshape(B * T, C)

    # Fused QKV projection: one tiled matmul over concatenated weights
    # (x is read from HBM once instead of three times).
    w_qkv = jnp.concatenate([params["wq"], params["wk"], params["wv"]], axis=1)
    qkv = matmul(x2, w_qkv)                                   # (B*T, (H+2G)*D)
    q = qkv[:, : H * D].reshape(B, T, H, D).transpose(0, 2, 1, 3)
    k = qkv[:, H * D:(H + G) * D].reshape(B, T, G, D).transpose(0, 2, 1, 3)
    v = qkv[:, (H + G) * D:].reshape(B, T, G, D).transpose(0, 2, 1, 3)

    tq = _pick_tile(T, tq_pref, 8)
    tk = _pick_tile(T, tk_pref, 8)

    # RoPE applied once per (batch, head, pos) for q and once per
    # (batch, group, pos) for k — no rep-times redundant K-RoPE.
    q = apply_rope_pallas(q, cos, sin, tq)
    k = apply_rope_pallas(k, cos, sin, tq)

    y = flash_attention(q, k, v, tq=tq, tk=tk)                # (B, H, T, D)

    # O projection reads (B, H, T, D) directly; transpose folded into index_map.
    return o_proj(y, params["wo"])                            # (B, T, C)


# --------------------------------------------------------------------------
# Pure-JAX reference (mirrors the PyTorch forward) for correctness checks.
# --------------------------------------------------------------------------
def _ref_rope(x, cos, sin):
    d = x.shape[-1]
    x1 = x[..., : d // 2]
    x2 = x[..., d // 2:]
    rotated = jnp.concatenate((-x2, x1), axis=-1)
    return x * cos + rotated * sin


def ref_forward(x, params, cos, sin, n_heads, n_query_groups):
    B, T, C = x.shape
    D = C // n_heads
    rep = n_heads // n_query_groups
    q = (x @ params["wq"]).reshape(B, T, n_heads, D).transpose(0, 2, 1, 3)
    k = (x @ params["wk"]).reshape(B, T, n_query_groups, D).transpose(0, 2, 1, 3)
    v = (x @ params["wv"]).reshape(B, T, n_query_groups, D).transpose(0, 2, 1, 3)
    q = _ref_rope(q, cos, sin)
    k = _ref_rope(k, cos, sin)
    if n_query_groups not in (1, n_heads):
        k = jnp.repeat(k, rep, axis=1)
        v = jnp.repeat(v, rep, axis=1)
    scale = 1.0 / math.sqrt(D)
    s = jnp.einsum("bhqd,bhkd->bhqk", q, k) * scale
    causal = jnp.tril(jnp.ones((T, T), dtype=bool))
    s = jnp.where(causal[None, None], s, -1e30)
    p = jax.nn.softmax(s, axis=-1)
    y = jnp.einsum("bhqk,bhkd->bhqd", p, v)
    y = y.transpose(0, 2, 1, 3).reshape(B, T, C)
    return y @ params["wo"]


def _make_inputs(key, B, T, C, n_heads, n_query_groups):
    D = C // n_heads
    kx, kq, kk, kv, ko = jax.random.split(key, 5)
    x = jax.random.normal(kx, (B, T, C), dtype=jnp.float32)
    params = {
        "wq": 0.1 * jax.random.normal(kq, (C, n_heads * D), dtype=jnp.float32),
        "wk": 0.1 * jax.random.normal(kk, (C, n_query_groups * D), dtype=jnp.float32),
        "wv": 0.1 * jax.random.normal(kv, (C, n_query_groups * D), dtype=jnp.float32),
        "wo": 0.1 * jax.random.normal(ko, (C, C), dtype=jnp.float32),
    }
    pos = jnp.arange(T, dtype=jnp.float32)
    inv_freq = 1.0 / (10000.0 ** (jnp.arange(0, D, 2, dtype=jnp.float32) / D))
    angles = pos[:, None] * inv_freq[None, :]                 # (T, D//2)
    cos = jnp.concatenate([jnp.cos(angles), jnp.cos(angles)], axis=-1)
    sin = jnp.concatenate([jnp.sin(angles), jnp.sin(angles)], axis=-1)
    return x, params, cos, sin


if __name__ == "__main__":
    key = jax.random.PRNGKey(0)

    # Config 1: tiny shapes matching the module's toy use (single-block path).
    B, T, C, H, G = 2, 8, 32, 4, 2
    x, params, cos, sin = _make_inputs(key, B, T, C, H, G)
    y = self_attention_forward(x, params, cos, sin, H, G)
    y = jax.block_until_ready(y)
    y_ref = ref_forward(x, params, cos, sin, H, G)
    np.testing.assert_allclose(np.asarray(y), np.asarray(y_ref),
                               rtol=1e-2, atol=1e-2)

    # Config 2: still small, but exercises the flash q/kv tiling, causal tile
    # skip, GQA index_map sharing, and multi-block projections.
    B2, T2, C2, H2, G2 = 1, 512, 256, 4, 2
    x2, params2, cos2, sin2 = _make_inputs(jax.random.PRNGKey(0), B2, T2, C2, H2, G2)
    y2 = self_attention_forward(x2, params2, cos2, sin2, H2, G2,
                                tq_pref=128, tk_pref=128)
    y2 = jax.block_until_ready(y2)
    y2_ref = ref_forward(x2, params2, cos2, sin2, H2, G2)
    np.testing.assert_allclose(np.asarray(y2), np.asarray(y2_ref),
                               rtol=1e-2, atol=1e-2)

    print("KERNEL_OK")
</pallas_src>

<mosaic_0001>
module attributes {stable_mosaic.version = 11 : i64} {
  func.func @_matmul_kernel(%arg0: i32, %arg1: i32, %arg2: i32, %arg3: memref<16x32xf32, #tpu.memory_space<vmem>>, %arg4: memref<32x64xf32, #tpu.memory_space<vmem>>, %arg5: memref<16x64xf32, #tpu.memory_space<vmem>>, %arg6: memref<16x64xf32, #tpu.memory_space<vmem>>) attributes {dimension_semantics = [#tpu.dimension_semantics<parallel>, #tpu.dimension_semantics<parallel>, #tpu.dimension_semantics<arbitrary>], iteration_bounds = array<i64: 1, 1, 1>, scalar_prefetch = 0 : i64, scratch_operands = 1 : i64, tpu.core_type = #tpu.core_type<tc>, window_params = [{transform_indices = @transform_0, window_bounds = array<i64: 16, 32>}, {transform_indices = @transform_1, window_bounds = array<i64: 32, 64>}, {transform_indices = @transform_2, window_bounds = array<i64: 16, 64>}]} {
    %c0_i32 = arith.constant 0 : i32
    %0 = arith.cmpi eq, %arg2, %c0_i32 : i32
    %1 = arith.extui %0 : i1 to i32
    %c0_i32_0 = arith.constant 0 : i32
    %2 = arith.cmpi ne, %1, %c0_i32_0 : i32
    scf.if %2 {
      %cst_10 = arith.constant 0.000000e+00 : f32
      %12 = vector.broadcast %cst_10 : f32 to vector<16x64xf32>
      %c0_11 = arith.constant 0 : index
      %c0_12 = arith.constant 0 : index
      %13 = vector.load %arg6[%c0_11, %c0_12] : memref<16x64xf32, #tpu.memory_space<vmem>>, vector<16x64xf32>
      tpu.vector_store %arg6[%c0_11, %c0_12], %12 {strides = array<i32>} : memref<16x64xf32, #tpu.memory_space<vmem>>, vector<16x64xf32>,
    } else {
    }
    %c0 = arith.constant 0 : index
    %c0_1 = arith.constant 0 : index
    %3 = vector.load %arg6[%c0, %c0_1] : memref<16x64xf32, #tpu.memory_space<vmem>>, vector<16x64xf32>
    %c0_2 = arith.constant 0 : index
    %c0_3 = arith.constant 0 : index
    %4 = vector.load %arg3[%c0_2, %c0_3] : memref<16x32xf32, #tpu.memory_space<vmem>>, vector<16x32xf32>
    %c0_4 = arith.constant 0 : index
    %c0_5 = arith.constant 0 : index
    %5 = vector.load %arg4[%c0_4, %c0_5] : memref<32x64xf32, #tpu.memory_space<vmem>>, vector<32x64xf32>
    %cst = arith.constant dense<0.000000e+00> : vector<16x64xf32>
    %6 = tpu.matmul %4, %5, %cst {dimension_numbers = #tpu.dot_dimension_numbers<[1], [0], [0], [1], [0, 0, 1, 1], [], []>} : vector<16x32xf32>, vector<32x64xf32>, vector<16x64xf32> -> vector<16x64xf32>
    %7 = arith.addf %3, %6 : vector<16x64xf32>
    %c0_6 = arith.constant 0 : index
    %c0_7 = arith.constant 0 : index
    %8 = vector.load %arg6[%c0_6, %c0_7] : memref<16x64xf32, #tpu.memory_space<vmem>>, vector<16x64xf32>
    tpu.vector_store %arg6[%c0_6, %c0_7], %7 {strides = array<i32>} : memref<16x64xf32, #tpu.memory_space<vmem>>, vector<16x64xf32>,
    %c0_i32_8 = arith.constant 0 : i32
    %9 = arith.cmpi eq, %arg2, %c0_i32_8 : i32
    %10 = arith.extui %9 : i1 to i32
    %c0_i32_9 = arith.constant 0 : i32
    %11 = arith.cmpi ne, %10, %c0_i32_9 : i32
    scf.if %11 {
      %c0_10 = arith.constant 0 : index
      %c0_11 = arith.constant 0 : index
      %12 = vector.load %arg6[%c0_10, %c0_11] : memref<16x64xf32, #tpu.memory_space<vmem>>, vector<16x64xf32>
      %c0_12 = arith.constant 0 : index
      %c0_13 = arith.constant 0 : index
      %13 = vector.load %arg5[%c0_12, %c0_13] : memref<16x64xf32, #tpu.memory_space<vmem>>, vector<16x64xf32>
      tpu.vector_store %arg5[%c0_12, %c0_13], %12 {strides = array<i32>} : memref<16x64xf32, #tpu.memory_space<vmem>>, vector<16x64xf32>,
    } else {
    }
    return
  }
  func.func @transform_0(%arg0: i32, %arg1: i32, %arg2: i32) -> (i32, i32) {
    %c0_i32 = arith.constant 0 : i32
    return %arg0, %arg2 : i32, i32
  }
  func.func @transform_1(%arg0: i32, %arg1: i32, %arg2: i32) -> (i32, i32) {
    %c0_i32 = arith.constant 0 : i32
    return %arg2, %arg1 : i32, i32
  }
  func.func @transform_2(%arg0: i32, %arg1: i32, %arg2: i32) -> (i32, i32) {
    %c0_i32 = arith.constant 0 : i32
    return %arg0, %arg1 : i32, i32
  }
}

</mosaic_0001>

<bundles_post_ra>
// kernel: tpu_custom_call.1
= control target key start
LH: loop header
LB: loop body
LE: loop exit
PB: predicated region body
PF: predicated region fallthrough
CT: control target
= control target key end

     0   :  { %7 = vsyncpa [#allocation4], 0  ;;  %s344_s0 = inlined_call_operand.hbm [shape: f32[16,32], index: 0, kind: input, shape index: {}]   ;;  %s345_s1 = inlined_call_operand.hbm [shape: f32[32,64], index: 1, kind: input, shape index: {}]   ;;  %s346_s2 = inlined_call_operand.hbm [shape: f32[16,64], index: 2, kind: output, shape index: {}]  }
   0x1   :  { %8 = vsyncpa [#allocation7], 0 }
   0x2   :  { %9 = vsyncpa [#allocation5], 0  ;;  %s272_s9 = smov [#allocation3]   ;;  %s200_s13 = scalar_lea.hbm %s344_s0, 256 }
   0x3   :  { %s15_s10 = sshll.u32 %s272_s9, 4  ;;  %p201_p0 = scmp.ne.s32.totalorder %s344_s0, %s200_s13  ;;  %s16_s10 = int_to_ptr.vmem [resolvable:$true] %s15_s10 }
   0x4   :  { %p204_p1 = scmp.lt.u32.totalorder %s200_s13, %s344_s0 }
   0x6   :  { %p206_p2 = pnand %p204_p1, %p201_p0 }
   0x8   :  { %209 = shalt.err (!%p206_p2)
}
   0x9   :  { %s210_s18 = scalar_lea.vmem %s16_s10, 256  ;;  %p215_p4 = scmp.lt.s32.totalorder %s16_s10, %s16_s10 }
   0xa   :  { %p211_p3 = scmp.ne.s32.totalorder %s16_s10, %s210_s18  ;;  %p216_p5 = scmp.lt.s32.totalorder %s210_s18, %s210_s18 }
   0xc   :  { %p217_p6 = por %p216_p5, %p215_p4 }
   0xe   :  { %p218_p7 = pnand %p217_p6, %p211_p3 }
  0x10   :  { %221 = shalt.err (!%p218_p7)
}
  0x11   :  { %s273_s19 = smov 128   ;;  %s274_s20 = smov 8  }
  0x12   :  { %21 = dma.hbm_to_vmem [thread:$0]  %s344_s0, 256, %s16_s10, [#allocation4], %s273_s19, %s273_s19, %s274_s20  }
  0x13   :  { %s275_s23 = smov [#allocation6]   ;;  %s222_s27 = scalar_lea.hbm %s345_s1, 512 }
  0x14   :  { %s27_s24 = sshll.u32 %s275_s23, 4  ;;  %p223_p8 = scmp.ne.s32.totalorder %s345_s1, %s222_s27  ;;  %s28_s24 = int_to_ptr.vmem [resolvable:$true] %s27_s24 }
  0x15   :  { %p226_p9 = scmp.lt.u32.totalorder %s222_s27, %s345_s1 }
  0x17   :  { %p228_p10 = pnand %p226_p9, %p223_p8 }
  0x19   :  { %231 = shalt.err (!%p228_p10)
}
  0x1a   :  { %s232_s4 = scalar_lea.vmem %s28_s24, 512  ;;  %p237_p12 = scmp.lt.s32.totalorder %s28_s24, %s28_s24 }
  0x1b   :  { %p233_p11 = scmp.ne.s32.totalorder %s28_s24, %s232_s4  ;;  %p238_p13 = scmp.lt.s32.totalorder %s232_s4, %s232_s4 }
  0x1d   :  { %p239_p0 = por %p238_p13, %p237_p12 }
  0x1f   :  { %p240_p1 = pnand %p239_p0, %p233_p11 }
  0x21   :  { %243 = shalt.err (!%p240_p1)
}
  0x22   :  { %33 = dma.hbm_to_vmem [thread:$0]  %s345_s1, 512, %s28_s24, [#allocation7], %s273_s19, %s273_s19, %s274_s20  }
  0x23   :  { %266 = dma.done.wait [#allocation4], 256  }
  0x24   :  { %267 = vsyncadd [#allocation4], 4294967040 }
  0x25   :  { %268 = dma.done.wait [#allocation7], 512  }
  0x26   :  { %269 = vsyncadd [#allocation7], 4294966784  ;;  %vm44_vm0 = vcmask 523264   ;;  %v276_v0 = vmov 0.0   ;;  %vm55_vm1 = vcmask 261120   ;;  %v51_v1 = vld [vmem:[#allocation6] sm:$0xff] }
  0x27   :  { %46 = vst.msk [vmem:[#allocation2 + $0x8] sm:$0xff] %vm44_vm0, %v276_v0  ;;  %45 = vst.msk [vmem:[#allocation2] sm:$0xff] %vm44_vm0, %v276_v0  ;;  %v52_v2 = vld [vmem:[#allocation6 + $0x8] sm:$0xff]  ;;  %v53_v3 = vld [vmem:[#allocation6 + $0x10] sm:$0xff]  ;;  %s277_s1 = smov [#allocation8]  }
  0x28   :  { %v186_v4 = vpack.c.bf16 %v52_v2, %v51_v1  ;;  %v54_v5 = vld [vmem:[#allocation6 + $0x18] sm:$0xff]  ;;  %v49_v6 = vld [vmem:[#allocation3] sm:$0xff]  ;;  %s154_s6 = sshll.u32 %s277_s1, 4  ;;  %s155_s6 = int_to_ptr.vmem [resolvable:$true] %s154_s6 }
  0x29   :  { %v190_v7 = vpack.c.bf16 %v54_v5, %v53_v3  ;;  %183 = vmatprep.mubr.msk.f32.mxu0 %vm55_vm1, %v49_v6  ;;  %v50_v8 = vld [vmem:[#allocation3 + $0x8] sm:$0xff]  ;;  %s244_s7 = scalar_lea.vmem %s155_s6, 256  ;;  %p249_p3 = scmp.lt.s32.totalorder %s155_s6, %s155_s6 }
  0x2a   :  { %187 = vmatprep.subr.bf16.mxu0 %v186_v4  ;;  %p245_p2 = scmp.ne.s32.totalorder %s155_s6, %s244_s7  ;;  %p250_p4 = scmp.lt.s32.totalorder %s244_s7, %s244_s7 }
  0x2b   :  { %189 = vmatpush3.bf16.msra.mxu0 %v186_v4 }
  0x2c   :  { %191 = vmatprep.subr.bf16.mxu0 %v190_v7  ;;  %p251_p5 = por %p250_p4, %p249_p3 }
  0x2e   :  { %v48_v9 = vld [vmem:[#allocation2 + $0x8] sm:$0xff]  ;;  %v47_v10 = vld [vmem:[#allocation2] sm:$0xff]  ;;  %p252_p6 = pnand %p251_p5, %p245_p2 }
  0x2f   :  { %193 = vmatpush3.bf16.msra.mxu0 %v190_v7 }
  0x32   :  { %184 = vmatmul.mubr.msk.f32.vlgmr.msra.gmra.mrb[0].mxu0 %vm55_vm1, %v50_v8 }
 0x105   :  { %v185_v11 = vpop.f32.mrb[0].mxu0 }
 0x106   :  { %v138_v12 = vadd.f32 %v185_v11, %v48_v9  ;;  %v128_v13 = vpop.f32.mrb[1].mxu0 }
 0x107   :  { %v137_v14 = vadd.f32 %v128_v13, %v47_v10 }
 0x108   :  { %141 = vst.msk [vmem:[#allocation2 + $0x8] sm:$0xff] %vm44_vm0, %v138_v12 }
 0x109   :  { %140 = vst.msk [vmem:[#allocation2] sm:$0xff] %vm44_vm0, %v137_v14 }
 0x10f   :  { %v146_v15 = vld [vmem:[#allocation2 + $0x8] sm:$0xff] }
 0x110   :  { %v145_v16 = vld [vmem:[#allocation2] sm:$0xff]  ;;  %148 = vst.msk [vmem:[#allocation8 + $0x8] sm:$0xff] %vm44_vm0, %v146_v15 }
 0x111   :  { %147 = vst.msk [vmem:[#allocation8] sm:$0xff] %vm44_vm0, %v145_v16 }
 0x112   :  { %255 = shalt.err (!%p252_p6)
}
 0x113   :  { %s256_s10 = scalar_lea.hbm %s346_s2, 256 }
 0x114   :  { %p257_p7 = scmp.ne.s32.totalorder %s346_s2, %s256_s10  ;;  %p260_p8 = scmp.lt.u32.totalorder %s256_s10, %s346_s2 }
 0x116   :  { %p262_p9 = pnand %p260_p8, %p257_p7 }
 0x118   :  { %265 = shalt.err (!%p262_p9)
}
 0x119   :  { %160 = dma.vmem_to_hbm [thread:$0]  %s155_s6, 256, %s346_s2, [#allocation5], %s273_s19, %s273_s19, %s274_s20  }
 0x11a   :  { %270 = dma.done.wait [#allocation5], 256  }
 0x11b   :  { %271 = vsyncadd [#allocation5], 4294967040 }
 0x11c   :  { %164 = vsyncpa [#allocation4], 1 }
 0x11d   :  { %165 = vsyncpa [#allocation7], 1 }
 0x11e   :  { %166 = vsyncpa [#allocation5], 1 }

</bundles_post_ra>
